<compile_context>
chip_gen: v6e
topology: v6e:2x2x1
jax: 0.10.0
libtpu: 0.0.40
codegen_flags: <defaults>
</compile_context>

<pallas_src>
import jax
import jax.numpy as jnp
from jax.experimental import pallas as pl
from jax.experimental.pallas import tpu as pltpu


def fused_mlp_kernel(x_ref, w1_ref, b1_ref, w2_ref, b2_ref, o_ref, act_ref):
    s = pl.program_id(1)

    # First stage of this batch tile: load the input activation into the
    # f32 VMEM carry buffer.
    @pl.when(s == 0)
    def _():
        act_ref[...] = x_ref[...].astype(jnp.float32)

    # h = relu(x @ W1 + b1): MXU operands in the weights' dtype (bf16 or f32),
    # f32 accumulation; bias-add / ReLU stay in f32 (works on v5e's f32-only VPU).
    xin = act_ref[...].astype(w1_ref.dtype)
    h = jnp.dot(xin, w1_ref[...], preferred_element_type=jnp.float32)
    h = jnp.maximum(h + b1_ref[...].astype(jnp.float32), 0.0)

    # y = h @ W2 + b2
    y = jnp.dot(h.astype(w2_ref.dtype), w2_ref[...],
                preferred_element_type=jnp.float32)
    y = y + b2_ref[...].astype(jnp.float32)

    # Carry the activation to the next stage in VMEM (no HBM round trip).
    act_ref[...] = y

    @pl.when(s == pl.num_programs(1) - 1)
    def _():
        o_ref[...] = y.astype(o_ref.dtype)


def _pick_batch_tile(B, H):
    """MXU-sized batch tile: >=128 rows when possible, capped so the (tb, H)
    f32 intermediate stays ~<=2 MiB (avoids vreg spills), and split into >=2
    grid steps when the batch is large enough so both v7x TensorCores get work."""
    cap = max(8, min(512, (2 << 20) // max(4 * H, 1)))
    cap = (cap // 8) * 8
    if B <= cap:
        if B >= 256 and B % 2 == 0 and (B // 2) % 8 == 0:
            return B // 2, B          # >=2 parallel grid steps for megacore
        return B, B                   # small batch: one full-extent tile
    tb = cap
    Bp = pl.cdiv(B, tb) * tb          # pad batch to a tile multiple
    return tb, Bp


def mlp_forward(x, params, *, compute_dtype=None):
    """Fused multi-stage MLP: for each stage, x = relu(x@W1+b1) @ W2 + b2.

    `compute_dtype=jnp.bfloat16` feeds the MXU bf16 operands (f32 accumulation),
    which is the fast path on v6e/v7x; f32 elementwise math is kept either way.
    """
    S = len(params)
    B, D = x.shape
    H = params[0][0].shape[1]

    w_dtype = compute_dtype if compute_dtype is not None else x.dtype
    w1 = jnp.stack([p[0] for p in params]).astype(w_dtype)       # (S, D, H)
    b1 = jnp.stack([p[1] for p in params]).astype(jnp.float32)   # (S, 1, H)
    w2 = jnp.stack([p[2] for p in params]).astype(w_dtype)       # (S, H, D)
    b2 = jnp.stack([p[3] for p in params]).astype(jnp.float32)   # (S, 1, D)

    tb, Bp = _pick_batch_tile(B, H)
    x_in = x if Bp == B else jnp.pad(x, ((0, Bp - B), (0, 0)))
    if compute_dtype is not None:
        x_in = x_in.astype(compute_dtype)

    wbytes = jnp.dtype(w_dtype).itemsize
    xbytes = jnp.dtype(x_in.dtype).itemsize
    obytes = jnp.dtype(x.dtype).itemsize

    # Explicit VMEM budget: double-buffered x/out tiles and per-stage weights,
    # plus the f32 carry scratch and intermediates. Clamp to 64 MiB (v7x physical).
    vmem_est = (2 * tb * D * xbytes + 2 * tb * D * obytes
                + 2 * (D * H + H * D) * wbytes + 2 * (H + D) * 4
                + tb * D * 4 + tb * H * 4 + tb * D * 4)
    vmem_limit = int(min(64 * 1024 * 1024,
                         max(vmem_est * 3 // 2, 32 * 1024 * 1024)))
    # TODO(synk): for very large D/H (per-stage weights that do not fit VMEM),
    # add K/N grid tiling of W1/W2 with a f32 accumulator scratch.

    cost = pl.CostEstimate(
        flops=4 * Bp * S * D * H,
        transcendentals=0,
        bytes_accessed=(Bp * D * xbytes + Bp * D * obytes
                        + S * (2 * D * H) * wbytes + S * (H + D) * 4),
    )

    out = pl.pallas_call(
        fused_mlp_kernel,
        out_shape=jax.ShapeDtypeStruct((Bp, D), x.dtype),
        grid_spec=pltpu.PrefetchScalarGridSpec(
            num_scalar_prefetch=0,
            grid=(Bp // tb, S),          # stage axis last: sequential carry
            in_specs=[
                pl.BlockSpec((tb, D), lambda i, s: (i, 0)),          # x tile
                pl.BlockSpec((None, D, H), lambda i, s: (s, 0, 0)),  # W1[s]
                pl.BlockSpec((None, 1, H), lambda i, s: (s, 0, 0)),  # b1[s]
                pl.BlockSpec((None, H, D), lambda i, s: (s, 0, 0)),  # W2[s]
                pl.BlockSpec((None, 1, D), lambda i, s: (s, 0, 0)),  # b2[s]
            ],
            out_specs=pl.BlockSpec((tb, D), lambda i, s: (i, 0)),
            scratch_shapes=[pltpu.VMEM((tb, D), jnp.float32)],
        ),
        compiler_params=pltpu.CompilerParams(
            dimension_semantics=("parallel", "arbitrary"),
            vmem_limit_bytes=vmem_limit),
        cost_estimate=cost,
    )(x_in, w1, b1, w2, b2)

    return out[:B] if Bp != B else out


def init_linear(key, fan_in, fan_out, dtype=jnp.float32):
    """PyTorch nn.Linear default init: U(-1/sqrt(fan_in), 1/sqrt(fan_in))."""
    kw, kb = jax.random.split(key)
    bound = 1.0 / (fan_in ** 0.5)
    # stored as (in, out) so the kernel does x @ W
    w = jax.random.uniform(kw, (fan_in, fan_out), dtype, -bound, bound)
    b = jax.random.uniform(kb, (1, fan_out), dtype, -bound, bound)
    return w, b


def mlp_forward_ref(x, params, compute_dtype=None):
    """Pure-JAX reference mirroring the kernel numerics (f32 accumulation)."""
    cd = compute_dtype if compute_dtype is not None else x.dtype
    h = x.astype(jnp.float32)
    for (w1, b1, w2, b2) in params:
        a = jnp.dot(h.astype(cd), w1.astype(cd),
                    preferred_element_type=jnp.float32)
        h = jnp.maximum(a + b1.astype(jnp.float32), 0.0)
        a = jnp.dot(h.astype(cd), w2.astype(cd),
                    preferred_element_type=jnp.float32)
        h = a + b2.astype(jnp.float32)
    return h.astype(x.dtype)


if __name__ == "__main__":
    # Small shapes consistent with the module: x is (batch, input_size);
    # NUM_STAGES stands in for len(gpus_to_populate).
    B, INPUT_SIZE, HIDDEN_SIZE = 256, 256, 128
    NUM_STAGES = 2

    key = jax.random.PRNGKey(0)
    kx, kp = jax.random.split(key)
    x = jax.random.normal(kx, (B, INPUT_SIZE), jnp.float32)

    params = []
    for _ in range(NUM_STAGES):
        k1, k2, kp = jax.random.split(kp, 3)
        w1, b1 = init_linear(k1, INPUT_SIZE, HIDDEN_SIZE)
        w2, b2 = init_linear(k2, HIDDEN_SIZE, INPUT_SIZE)
        params.append((w1, b1, w2, b2))

    # f32 path: exact check against the reference.
    out_f32 = jax.block_until_ready(mlp_forward(x, params))
    ref_f32 = mlp_forward_ref(x, params)
    assert out_f32.shape == (B, INPUT_SIZE)
    assert jnp.allclose(out_f32, ref_f32, atol=1e-4, rtol=1e-4)

    # bf16 MXU-operand path (f32 accumulation): loose tolerance vs bf16 reference.
    out_bf16 = jax.block_until_ready(
        mlp_forward(x, params, compute_dtype=jnp.bfloat16))
    ref_bf16 = mlp_forward_ref(x, params, compute_dtype=jnp.bfloat16)
    assert out_bf16.shape == (B, INPUT_SIZE)
    assert jnp.allclose(out_bf16, ref_bf16, atol=2e-2, rtol=2e-2)

    print("KERNEL_OK")
</pallas_src>

<mosaic_0001>
module attributes {stable_mosaic.version = 11 : i64} {
  func.func @fused_mlp_kernel(%arg0: i32, %arg1: i32, %arg2: memref<128x256xf32, #tpu.memory_space<vmem>>, %arg3: memref<1x256x128xf32, #tpu.memory_space<vmem>>, %arg4: memref<1x1x128xf32, #tpu.memory_space<vmem>>, %arg5: memref<1x128x256xf32, #tpu.memory_space<vmem>>, %arg6: memref<1x1x256xf32, #tpu.memory_space<vmem>>, %arg7: memref<128x256xf32, #tpu.memory_space<vmem>>, %arg8: memref<128x256xf32, #tpu.memory_space<vmem>>) attributes {dimension_semantics = [#tpu.dimension_semantics<parallel>, #tpu.dimension_semantics<arbitrary>], iteration_bounds = array<i64: 2, 2>, scalar_prefetch = 0 : i64, scratch_operands = 1 : i64, tpu.core_type = #tpu.core_type<tc>, window_params = [{transform_indices = @transform_0, window_bounds = array<i64: 128, 256>}, {transform_indices = @transform_1, window_bounds = array<i64: 1, 256, 128>}, {transform_indices = @transform_2, window_bounds = array<i64: 1, 1, 128>}, {transform_indices = @transform_3, window_bounds = array<i64: 1, 128, 256>}, {transform_indices = @transform_4, window_bounds = array<i64: 1, 1, 256>}, {transform_indices = @transform_5, window_bounds = array<i64: 128, 256>}]} {
    %c0_i32 = arith.constant 0 : i32
    %0 = arith.cmpi eq, %arg1, %c0_i32 : i32
    %1 = arith.extui %0 : i1 to i32
    %c0_i32_0 = arith.constant 0 : i32
    %2 = arith.cmpi ne, %1, %c0_i32_0 : i32
    scf.if %2 {
      %c0_19 = arith.constant 0 : index
      %c0_20 = arith.constant 0 : index
      %24 = vector.load %arg2[%c0_19, %c0_20] : memref<128x256xf32, #tpu.memory_space<vmem>>, vector<128x256xf32>
      %c0_21 = arith.constant 0 : index
      %c0_22 = arith.constant 0 : index
      %25 = vector.load %arg8[%c0_21, %c0_22] : memref<128x256xf32, #tpu.memory_space<vmem>>, vector<128x256xf32>
      tpu.vector_store %arg8[%c0_21, %c0_22], %24 {strides = array<i32>} : memref<128x256xf32, #tpu.memory_space<vmem>>, vector<128x256xf32>,
    } else {
    }
    %c0 = arith.constant 0 : index
    %c0_1 = arith.constant 0 : index
    %3 = vector.load %arg8[%c0, %c0_1] : memref<128x256xf32, #tpu.memory_space<vmem>>, vector<128x256xf32>
    %c0_2 = arith.constant 0 : index
    %c0_3 = arith.constant 0 : index
    %c0_4 = arith.constant 0 : index
    %4 = vector.load %arg3[%c0_2, %c0_3, %c0_4] : memref<1x256x128xf32, #tpu.memory_space<vmem>>, vector<1x256x128xf32>
    %5 = vector.shape_cast %4 : vector<1x256x128xf32> to vector<256x128xf32>
    %cst = arith.constant dense<0.000000e+00> : vector<128x128xf32>
    %6 = tpu.matmul %3, %5, %cst {dimension_numbers = #tpu.dot_dimension_numbers<[1], [0], [0], [1], [0, 0, 1, 1], [], []>} : vector<128x256xf32>, vector<256x128xf32>, vector<128x128xf32> -> vector<128x128xf32>
    %c0_5 = arith.constant 0 : index
    %c0_6 = arith.constant 0 : index
    %c0_7 = arith.constant 0 : index
    %7 = vector.load %arg4[%c0_5, %c0_6, %c0_7] : memref<1x1x128xf32, #tpu.memory_space<vmem>>, vector<1x1x128xf32>
    %8 = vector.shape_cast %7 : vector<1x1x128xf32> to vector<1x128xf32>
    %9 = vector.broadcast %8 : vector<1x128xf32> to vector<128x128xf32>
    %10 = arith.addf %6, %9 : vector<128x128xf32>
    %cst_8 = arith.constant 0.000000e+00 : f32
    %11 = vector.broadcast %cst_8 : f32 to vector<128x128xf32>
    %12 = arith.maximumf %10, %11 : vector<128x128xf32>
    %c0_9 = arith.constant 0 : index
    %c0_10 = arith.constant 0 : index
    %c0_11 = arith.constant 0 : index
    %13 = vector.load %arg5[%c0_9, %c0_10, %c0_11] : memref<1x128x256xf32, #tpu.memory_space<vmem>>, vector<1x128x256xf32>
    %14 = vector.shape_cast %13 : vector<1x128x256xf32> to vector<128x256xf32>
    %cst_12 = arith.constant dense<0.000000e+00> : vector<128x256xf32>
    %15 = tpu.matmul %12, %14, %cst_12 {dimension_numbers = #tpu.dot_dimension_numbers<[1], [0], [0], [1], [0, 0, 1, 1], [], []>} : vector<128x128xf32>, vector<128x256xf32>, vector<128x256xf32> -> vector<128x256xf32>
    %c0_13 = arith.constant 0 : index
    %c0_14 = arith.constant 0 : index
    %c0_15 = arith.constant 0 : index
    %16 = vector.load %arg6[%c0_13, %c0_14, %c0_15] : memref<1x1x256xf32, #tpu.memory_space<vmem>>, vector<1x1x256xf32>
    %17 = vector.shape_cast %16 : vector<1x1x256xf32> to vector<1x256xf32>
    %18 = vector.broadcast %17 : vector<1x256xf32> to vector<128x256xf32>
    %19 = arith.addf %15, %18 : vector<128x256xf32>
    %c0_16 = arith.constant 0 : index
    %c0_17 = arith.constant 0 : index
    %20 = vector.load %arg8[%c0_16, %c0_17] : memref<128x256xf32, #tpu.memory_space<vmem>>, vector<128x256xf32>
    tpu.vector_store %arg8[%c0_16, %c0_17], %19 {strides = array<i32>} : memref<128x256xf32, #tpu.memory_space<vmem>>, vector<128x256xf32>,
    %c1_i32 = arith.constant 1 : i32
    %21 = arith.cmpi eq, %arg1, %c1_i32 : i32
    %22 = arith.extui %21 : i1 to i32
    %c0_i32_18 = arith.constant 0 : i32
    %23 = arith.cmpi ne, %22, %c0_i32_18 : i32
    scf.if %23 {
      %c0_19 = arith.constant 0 : index
      %c0_20 = arith.constant 0 : index
      %24 = vector.load %arg7[%c0_19, %c0_20] : memref<128x256xf32, #tpu.memory_space<vmem>>, vector<128x256xf32>
      tpu.vector_store %arg7[%c0_19, %c0_20], %19 {strides = array<i32>} : memref<128x256xf32, #tpu.memory_space<vmem>>, vector<128x256xf32>,
    } else {
    }
    return
  }
  func.func @transform_0(%arg0: i32, %arg1: i32) -> (i32, i32) {
    %c0_i32 = arith.constant 0 : i32
    %c0_i32_0 = arith.constant 0 : i32
    return %arg0, %c0_i32 : i32, i32
  }
  func.func @transform_1(%arg0: i32, %arg1: i32) -> (i32, i32, i32) {
    %c0_i32 = arith.constant 0 : i32
    %c0_i32_0 = arith.constant 0 : i32
    %c0_i32_1 = arith.constant 0 : i32
    return %arg1, %c0_i32, %c0_i32_0 : i32, i32, i32
  }
  func.func @transform_2(%arg0: i32, %arg1: i32) -> (i32, i32, i32) {
    %c0_i32 = arith.constant 0 : i32
    %c0_i32_0 = arith.constant 0 : i32
    %c0_i32_1 = arith.constant 0 : i32
    return %arg1, %c0_i32, %c0_i32_0 : i32, i32, i32
  }
  func.func @transform_3(%arg0: i32, %arg1: i32) -> (i32, i32, i32) {
    %c0_i32 = arith.constant 0 : i32
    %c0_i32_0 = arith.constant 0 : i32
    %c0_i32_1 = arith.constant 0 : i32
    return %arg1, %c0_i32, %c0_i32_0 : i32, i32, i32
  }
  func.func @transform_4(%arg0: i32, %arg1: i32) -> (i32, i32, i32) {
    %c0_i32 = arith.constant 0 : i32
    %c0_i32_0 = arith.constant 0 : i32
    %c0_i32_1 = arith.constant 0 : i32
    return %arg1, %c0_i32, %c0_i32_0 : i32, i32, i32
  }
  func.func @transform_5(%arg0: i32, %arg1: i32) -> (i32, i32) {
    %c0_i32 = arith.constant 0 : i32
    %c0_i32_0 = arith.constant 0 : i32
    return %arg0, %c0_i32 : i32, i32
  }
}

</mosaic_0001>

<bundles_post_ra>
// kernel: tpu_custom_call.1
= control target key start
LH: loop header
LB: loop body
LE: loop exit
PB: predicated region body
PF: predicated region fallthrough
CT: control target
= control target key end

     0   :  { %s2159_s0 = inlined_call_operand.hbm [shape: f32[256,256], index: 0, kind: input, shape index: {}]   ;;  %s2160_s1 = inlined_call_operand.hbm [shape: f32[2,256,128], index: 1, kind: input, shape index: {}]   ;;  %s2161_s2 = inlined_call_operand.vmem [shape: f32[2,1,128], index: 2, kind: input, shape index: {}]   ;;  %s2162_s3 = inlined_call_operand.hbm [shape: f32[2,128,256], index: 3, kind: input, shape index: {}]   ;;  %s2163_s4 = inlined_call_operand.vmem [shape: f32[2,1,256], index: 4, kind: input, shape index: {}]   ;;  %s2164_s5 = inlined_call_operand.hbm [shape: f32[256,256], index: 5, kind: output, shape index: {}]  }
   0x1   :  { %2174 = sst [smem:[#allocation20_spill]] %s2160_s1 }
   0x2   :  { %2175 = sst [smem:[#allocation21_spill]] %s2161_s2 }
   0x3   :  { %2176 = sst [smem:[#allocation22_spill]] %s2162_s3 }
   0x4   :  { %2177 = sst [smem:[#allocation23_spill]] %s2163_s4 }
   0x5   :  { %2178 = sst [smem:[#allocation24_spill]] %s2164_s5 }
   0x6   :  { %10 = vsyncpa [#allocation4], 0 }
   0x7   :  { %12 = vsyncpa [#allocation4 + $0x1], 0 }
   0x8   :  { %13 = vsyncpa [#allocation7], 0 }
   0x9   :  { %15 = vsyncpa [#allocation7 + $0x1], 0 }
   0xa   :  { %16 = vsyncpa [#allocation5], 0 }
   0xb   :  { %18 = vsyncpa [#allocation5 + $0x1], 0  ;;  %s1587_s18 = smov 0   ;;  %s1589_s19 = smov 0  }
   0xc   :  { %s1591_s20 = smov 0   ;;  %s1593_s21 = smov 0  }
   0xd   :  { %s1595_s22 = smov 0   ;;  %s1597_s23 = smov 0  }
   0xe   :  { %s1599_s24 = smov 0   ;;  %s1601_s25 = smov 0  }
   0xf   :  { %s1603_s26 = smov 0   ;;  %s1605_s27 = smov 0  }
  0x10   :  { %s1607_s28 = smov 0  }
  0x11 LB: > { %2179 = sst [smem:[#allocation13_spill]] %s1512_s20  ;;  %s1641_s29 = sadd.s32 4294967295, %s1544_s28   ;;  %s1544_s28 = sphi %s1607_s28, %s24_s28   ;;  %s1540_s27 = sphi %s1605_s27, %s2219_s27   ;;  %s1536_s26 = sphi %s1603_s26, %s2211_s26   ;;  %s1532_s25 = sphi %s1601_s25, %s2218_s25   ;;  %s1528_s24 = sphi %s1599_s24, %s2210_s24   ;;  %s1524_s23 = sphi %s1597_s23, %s2217_s23   ;;  %s1520_s22 = sphi %s1595_s22, %s2216_s22   ;;  %s1516_s21 = sphi %s1593_s21, %s2215_s21   ;;  %s1512_s20 = sphi %s1591_s20, %s2208_s20   ;;  %s1508_s19 = sphi %s1589_s19, %s2214_s19   ;;  %s1504_s18 = sphi %s1587_s18, %s2213_s18  }
  0x12   : > { %2180 = sst [smem:[#allocation14_spill]] %s1516_s21  ;;  %s33_s30 = sadd.s32 1, %s1536_s26 }
  0x13   : > { %2181 = sst [smem:[#allocation15_spill]] %s1532_s25  ;;  %p1644_p0 = scmp.ge.s32.totalorder %s33_s30, 2 }
  0x14   : > { %2182 = sst [smem:[#allocation16_spill]] %s1536_s26  ;;  %p51_p1 = scmp.eq.s32.totalorder %s1544_s28, 0 }
  0x15   : > { %p57_p2 = scmp.eq.s32.totalorder %s1641_s29, 0  ;;  %s69_s7 = sadd.s32 1, %s1512_s20 }
  0x16   : > { %s2221_s30 = smov (%p1644_p0, %s33_s30), 0  ;;  %p76_p3 = scmp.ne.s32.totalorder %s1512_s20, %s1508_s19 }
  0x17   : > { %2184 = sst [smem:[#allocation17_spill]] %s2221_s30  ;;  %p82_p4 = scmp.ne.s32.totalorder %s1508_s19, %s1504_s18 }
  0x18   : > { %s66_s8 = ssub.s32 %s1536_s26, %s2221_s30  ;;  %p78_p6 = por %p76_p3, %p51_p1 }
  0x19   : > { %p67_p5 = scmp.eq.s32.totalorder %s66_s8, 0  ;;  %p1664_p7 = por %p82_p4, %p57_p2 }
  0x1a   : > { %p2168_p8 = scmp.lt.s32.totalorder %s1544_s28, 4  ;;  %s232_s11 = sand.u32 1, %s1544_s28  }
  0x1b   : > { %s1670_s10 = scalar_select %p67_p5, %s1512_s20, %s69_s7  }
  0x1c   : > { %s234_s12 = sand.u32 1, %s1512_s20   ;;  %s1133_s14 = sshll.u32 %s1536_s26, 12 }
  0x1d   : > { %2186 = sst [smem:[#allocation18_spill]] %s1670_s10  ;;  %s1674_s13 = sshll.u32 %s234_s12, 8 }
  0x1e   : > { %s2187_s1 = sld [smem:[#allocation20_spill]]  ;;  %s236_s18 = scalar_lea.vmem [#allocation6], %s1674_s13 }
  0x1f   : > { %s243_s8 = sshll.u32 %s236_s18, 4  ;;  %p1683_p9 = pnand %p2168_p8, %p78_p6  ;;  %s244_s8 = int_to_ptr.vmem [resolvable:$true] %s243_s8 }
  0x20   : > { %s1687_s7 = scalar_lea.sflag [#allocation7], %s232_s11  ;;  %s1349_s12 = scalar_lea.vmem %s244_s8, 4096 }
  0x21   : > { %p2167_p10 = pneg %p1683_p9  ;;  %p1350_p11 = scmp.ne.s32.totalorder %s244_s8, %s1349_s12 }
  0x22   : > { %s1546_s15 = smov [#allocation6]  }
  0x23   : > { %p1352_p12 = pnand %p1350_p11, %p2167_p10  ;;  %s1354_s16 = sshll.u32 %s1546_s15, 4  ;;  %s1355_s16 = int_to_ptr.vmem [resolvable:$false] %s1354_s16 }
  0x24   : > { %s242_s17 = scalar_lea.hbm %s2187_s1, %s1133_s14  ;;  %s1356_s18 = scalar_lea.vmem %s1355_s16, 8192 }
  0x25   : > { %p1353_p13 = pneg %p1352_p12  ;;  %p1357_p3 = scmp.lt.s32.totalorder %s244_s8, %s1355_s16 }
  0x26   : > { %p1358_p4 = scmp.lt.s32.totalorder %s1356_s18, %s1349_s12 }
  0x28   : > { %p1359_p5 = por %p1358_p4, %p1357_p3 }
  0x2a   : > { %p1360_p6 = pnand %p1359_p5, %p1353_p13 }
  0x2c   : > { %1363 = shalt.err (!%p1360_p6)
}
  0x2d   : > { %s1547_s1 = smov 128   ;;  %s1548_s11 = smov 8  }
  0x2e   : > { %1231 = dma.hbm_to_vmem [thread:$0]  (!%p1683_p9), %s242_s17, 4096, %s244_s8, %s1687_s7, %s1547_s1, %s1547_s1, %s1548_s11  }
  0x2f   : > { %s2189_s3 = sld [smem:[#allocation22_spill]]  ;;  %s263_s18 = scalar_lea.vmem [#allocation8], %s1674_s13 }
  0x30   : > { %s270_s26 = sshll.u32 %s263_s18, 4  ;;  %p1116_p11 = scmp.ge.s32.totalorder %s1544_s28, 1  ;;  %s1703_s26 = int_to_ptr.vmem [resolvable:$true] %s270_s26 }
  0x31   : > { %p285_p12 = scmp.lt.s32.totalorder %s1544_s28, 5  ;;  %s1103_s1 = sadd.s32 4294967294, %s1544_s28  }
  0x32   : > { %s36_s17 = sadd.s32 1, %s1540_s27  ;;  %p50_p3 = scmp.ne.s32.totalorder %s1524_s23, %s1520_s22 }
  0x33   : > { %p1707_p13 = pnand %p1116_p11, %p285_p12  ;;  %s2223_s17 = smov (!%p1644_p0, %s36_s17), %s1540_s27 }
  0x34   : > { %p38_p4 = scmp.ge.s32.totalorder %s2223_s17, 2  ;;  %p56_p5 = scmp.ne.s32.totalorder %s1520_s22, %s1516_s21 }
  0x35   : > { %s1700_s16 = scalar_lea.hbm %s2189_s3, %s1133_s14  ;;  %s43_s14 = sadd.s32 1, %s1524_s23 }
  0x36   : > { %p1723_p6 = por %p51_p1, %p50_p3  ;;  %p184_p11 = scmp.eq.s32.totalorder %s1641_s29, 3 }
  0x37   : > { %s2225_s17 = smov (%p38_p4, %s2223_s17), 0  ;;  %p1732_p12 = por %p57_p2, %p56_p5 }
  0x38   : > { %2192 = sst [smem:[#allocation19_spill]] %s2225_s17  ;;  %p1736_p0 = por %p184_p11, %p50_p3 }
  0x39   : > { %s40_s11 = ssub.s32 %s1540_s27, %s2225_s17  ;;  %p190_p1 = scmp.eq.s32.totalorder %s1103_s1, 3 }
  0x3a   : > { %s2194_s8 = scalar_select %p1736_p0, 1, 0 }
  0x3b   : > { %p41_p10 = scmp.eq.s32.totalorder %s40_s11, 0  ;;  %s210_s12 = sand.u32 1, %s1524_s23  }
  0x3c   : > { %p1743_p8 = por %p190_p1, %p56_p5  ;;  %s1106_s3 = sshll.u32 %s210_s12, 8 }
  0x3d   : > { %s1748_s18 = scalar_select %p41_p10, %s1524_s23, %s43_s14  }
  0x3e   : > { %s2195_s15 = scalar_select %p1743_p8, 1, 0 }
  0x3f   : > { %s1132_s20 = sshll.u32 %s1540_s27, 12  ;;  %s214_s4 = scalar_lea.vmem [#allocation3], %s1106_s3 }
  0x40   : > { %s221_s25 = scalar_lea.hbm %s2159_s0, %s1132_s20  ;;  %s222_s2 = sshll.u32 %s214_s4, 4  ;;  %s223_s2 = int_to_ptr.vmem [resolvable:$true] %s222_s2 }
  0x41   : > { %p2196_p2 = scmp.lt.s32.totalorder %s1544_s28, 4  ;;  %s211_s11 = scalar_lea.sflag [#allocation4], %s210_s12 }
  0x42   : > { %s1377_s14 = scalar_lea.vmem %s223_s2, 4096  ;;  %s1549_s17 = smov [#allocation3]  }
  0x43   : > { %p1758_p3 = pnand %p2196_p2, %p1723_p6  ;;  %p1378_p4 = scmp.ne.s32.totalorder %s223_s2, %s1377_s14 }
  0x44   : > { %s1382_s5 = sshll.u32 %s1549_s17, 4  ;;  %s1383_s5 = int_to_ptr.vmem [resolvable:$false] %s1382_s5 }
  0x45   : > { %p1366_p10 = pneg %p1758_p3  ;;  %s1384_s3 = scalar_lea.vmem %s1383_s5, 8192 }
  0x46   : > { %p1385_p1 = scmp.lt.s32.totalorder %s223_s2, %s1383_s5  ;;  %p1386_p8 = scmp.lt.s32.totalorder %s1384_s3, %s1377_s14 }
  0x47   : > { %p1380_p5 = pnand %p1378_p4, %p1366_p10 }
  0x48   : > { %p1387_p0 = por %p1386_p8, %p1385_p1 }
  0x49   : > { %p1381_p11 = pneg %p1380_p5 }
  0x4b   : > { %p1388_p6 = pnand %p1387_p0, %p1381_p11 }
  0x4d   : > { %1391 = shalt.err (!%p1388_p6)
}
  0x4e   : > { %s1550_s4 = smov 256   ;;  %s1551_s20 = smov 16  }
  0x4f   : > { %1228 = dma.hbm_to_vmem [thread:$0]  (!%p1758_p3), %s221_s25, 4096, %s223_s2, %s211_s11, %s1550_s4, %s1550_s4, %s1551_s20  }
  0x50   : > { %s1405_s21 = scalar_lea.vmem %s1703_s26, 4096  ;;  %p2198_p10 = pneg %p1683_p9 }
  0x51   : > { %p1406_p2 = scmp.ne.s32.totalorder %s1703_s26, %s1405_s21  ;;  %s1552_s17 = smov [#allocation8]  }
  0x52   : > { %s1410_s13 = sshll.u32 %s1552_s17, 4  ;;  %s1411_s13 = int_to_ptr.vmem [resolvable:$false] %s1410_s13 }
  0x53   : > { %p1408_p4 = pnand %p1406_p2, %p2198_p10  ;;  %s1412_s12 = scalar_lea.vmem %s1411_s13, 8192 }
  0x54   : > { %p1413_p8 = scmp.lt.s32.totalorder %s1703_s26, %s1411_s13  ;;  %p1414_p0 = scmp.lt.s32.totalorder %s1412_s12, %s1405_s21 }
  0x55   : > { %p1409_p5 = pneg %p1408_p4 }
  0x56   : > { %p1415_p11 = por %p1414_p0, %p1413_p8 }
  0x58   : > { %p1416_p1 = pnand %p1415_p11, %p1409_p5 }
  0x5a   : > { %1419 = shalt.err (!%p1416_p1)
}
  0x5b   : > { %1234 = dma.hbm_to_vmem [thread:$0]  (!%p1683_p9), %s1700_s16, 4096, %s1703_s26, %s1687_s7, %s1550_s4, %s1550_s4, %s1551_s20  }
  0x5c   : > { %289 = sbr.rel (%p1707_p13) target bundleno = 664 (0x298), region = 40  ;;  %s1780_s2 = sand.u32 (!%p1707_p13), 1, %s1520_s22  }
  0x5d   : > { %s1117_s25 = sshll.u32 (!%p1707_p13), %s1780_s2, 8  ;;  %s292_s1 = scalar_lea.sflag (!%p1707_p13), [#allocation4], %s1780_s2 }
  0x5e   : > { %s1784_s11 = scalar_lea.vmem (!%p1707_p13), [#allocation3], %s1117_s25 }
  0x61   : > { %1491 = dma.done.wait (%p1732_p12), %s292_s1, 4096  }
  0x62   : > { %1493 = vsyncadd (%p1732_p12), %s292_s1, 4294963200  ;;  %s300_s26 = sand.u32 1, %s1641_s29   ;;  %s302_s30 = sand.u32 1, %s1508_s19  }
  0x63   : > { %s1118_s10 = sshll.u32 %s302_s30, 8  ;;  %s301_s7 = scalar_lea.sflag [#allocation7], %s300_s26 }
  0x64   : > { %s1792_s16 = scalar_lea.vmem [#allocation6], %s1118_s10 }
  0x65   : > { %1495 = dma.done.wait (%p1664_p7), %s301_s7, 8192  }
  0x66   : > { %1497 = vsyncadd (%p1664_p7), %s301_s7, 4294959104  ;;  %p358_p9 = scmp.lt.s32.totalorder %s1528_s24, 1  ;;  %s2199_s3 = sld [smem:[#allocation21_spill]] }
  0x67   : > { %s2200_s17 = sld [smem:[#allocation23_spill]]  ;;  %s1812_s12 = scalar_lea.vmem [#allocation8], %s1118_s10 }
  0x68   : > { %s1800_s14 = scalar_select %p358_p9, %s1528_s24, 1 }
  0x69   : > { %s1814_s9 = scalar_lea.vmem [#allocation9], %s1117_s25  ;;  %p1122_p7 = scmp.ne.s32.totalorder %s1528_s24, 0 }
  0x6a   : > { %s1121_s4 = sshll.u32 %s1800_s14, 1 }
  0x6b   : > { %369 = sbr.rel (%p1122_p7) target bundleno = 129 (0x81), region = 56 }
  0x6c   : > { %s360_s29 = scalar_lea.vmem %s2199_s3, %s1800_s14 }
  0x6d   : > { %s1810_s13 = scalar_lea.vmem %s2200_s17, %s1121_s4 }
  0x70   : > { %v370_v0 = vld [vmem:[%s1784_s11] sm:$0xff]  ;;  %v371_v1 = vld [vmem:[%s1784_s11 + $0x8] sm:$0xff]  ;;  %v372_v2 = vld [vmem:[%s1784_s11 + $0x10] sm:$0xff] }
  0x71   : > { %402 = vst [vmem:[#allocation2 + $0xb0] sm:$0xff] %v370_v0  ;;  %403 = vst [vmem:[#allocation2] sm:$0xff] %v371_v1  ;;  %v373_v3 = vld [vmem:[%s1784_s11 + $0x18] sm:$0xff]  ;;  %v374_v4 = vld [vmem:[%s1784_s11 + $0x20] sm:$0xff] }
  0x72   : > { %404 = vst [vmem:[#allocation2 + $0xd8] sm:$0xff] %v372_v2  ;;  %v375_v5 = vld [vmem:[%s1784_s11 + $0x28] sm:$0xff]  ;;  %405 = vst [vmem:[#allocation2 + $0x18] sm:$0xff] %v373_v3  ;;  %v376_v6 = vld [vmem:[%s1784_s11 + $0x30] sm:$0xff] }
  0x73   : > { %406 = vst [vmem:[#allocation2 + $0x50] sm:$0xff] %v374_v4  ;;  %407 = vst [vmem:[#allocation2 + $0x68] sm:$0xff] %v375_v5  ;;  %v377_v7 = vld [vmem:[%s1784_s11 + $0x38] sm:$0xff]  ;;  %v378_v8 = vld [vmem:[%s1784_s11 + $0x40] sm:$0xff] }
  0x74   : > { %408 = vst [vmem:[#allocation2 + $0x30] sm:$0xff] %v376_v6  ;;  %409 = vst [vmem:[#allocation2 + $0x48] sm:$0xff] %v377_v7  ;;  %v379_v9 = vld [vmem:[%s1784_s11 + $0x48] sm:$0xff]  ;;  %v380_v10 = vld [vmem:[%s1784_s11 + $0x50] sm:$0xff] }
  0x75   : > { %410 = vst [vmem:[#allocation2 + $0x80] sm:$0xff] %v378_v8  ;;  %v381_v11 = vld [vmem:[%s1784_s11 + $0x58] sm:$0xff]  ;;  %411 = vst [vmem:[#allocation2 + $0x88] sm:$0xff] %v379_v9  ;;  %v382_v12 = vld [vmem:[%s1784_s11 + $0x60] sm:$0xff] }
  0x76   : > { %412 = vst [vmem:[#allocation2 + $0xe8] sm:$0xff] %v380_v10  ;;  %413 = vst [vmem:[#allocation2 + $0xb8] sm:$0xff] %v381_v11  ;;  %v383_v13 = vld [vmem:[%s1784_s11 + $0x68] sm:$0xff]  ;;  %v384_v14 = vld [vmem:[%s1784_s11 + $0x70] sm:$0xff] }
  0x77   : > { %414 = vst [vmem:[#allocation2 + $0x60] sm:$0xff] %v382_v12  ;;  %415 = vst [vmem:[#allocation2 + $0xf0] sm:$0xff] %v383_v13  ;;  %v385_v15 = vld [vmem:[%s1784_s11 + $0x78] sm:$0xff]  ;;  %v386_v16 = vld [vmem:[%s1784_s11 + $0x80] sm:$0xff] }
  0x78   : > { %416 = vst [vmem:[#allocation2 + $0x8] sm:$0xff] %v384_v14  ;;  %v387_v17 = vld [vmem:[%s1784_s11 + $0x88] sm:$0xff]  ;;  %417 = vst [vmem:[#allocation2 + $0x78] sm:$0xff] %v385_v15  ;;  %v388_v18 = vld [vmem:[%s1784_s11 + $0x90] sm:$0xff] }
  0x79   : > { %418 = vst [vmem:[#allocation2 + $0x38] sm:$0xff] %v386_v16  ;;  %419 = vst [vmem:[#allocation2 + $0x58] sm:$0xff] %v387_v17  ;;  %v389_v19 = vld [vmem:[%s1784_s11 + $0x98] sm:$0xff]  ;;  %v390_v20 = vld [vmem:[%s1784_s11 + $0xa0] sm:$0xff] }
  0x7a   : > { %420 = vst [vmem:[#allocation2 + $0x40] sm:$0xff] %v388_v18  ;;  %421 = vst [vmem:[#allocation2 + $0xc8] sm:$0xff] %v389_v19  ;;  %v391_v21 = vld [vmem:[%s1784_s11 + $0xa8] sm:$0xff]  ;;  %v392_v22 = vld [vmem:[%s1784_s11 + $0xb0] sm:$0xff] }
  0x7b   : > { %422 = vst [vmem:[#allocation2 + $0xe0] sm:$0xff] %v390_v20  ;;  %v393_v23 = vld [vmem:[%s1784_s11 + $0xb8] sm:$0xff]  ;;  %423 = vst [vmem:[#allocation2 + $0x90] sm:$0xff] %v391_v21  ;;  %v394_v24 = vld [vmem:[%s1784_s11 + $0xc0] sm:$0xff] }
  0x7c   : > { %424 = vst [vmem:[#allocation2 + $0x70] sm:$0xff] %v392_v22  ;;  %425 = vst [vmem:[#allocation2 + $0xc0] sm:$0xff] %v393_v23  ;;  %v395_v25 = vld [vmem:[%s1784_s11 + $0xc8] sm:$0xff]  ;;  %v396_v26 = vld [vmem:[%s1784_s11 + $0xd0] sm:$0xff] }
  0x7d   : > { %426 = vst [vmem:[#allocation2 + $0xa8] sm:$0xff] %v394_v24  ;;  %427 = vst [vmem:[#allocation2 + $0xd0] sm:$0xff] %v395_v25  ;;  %v397_v27 = vld [vmem:[%s1784_s11 + $0xd8] sm:$0xff]  ;;  %v398_v28 = vld [vmem:[%s1784_s11 + $0xe0] sm:$0xff] }
  0x7e   : > { %428 = vst [vmem:[#allocation2 + $0x10] sm:$0xff] %v396_v26  ;;  %v399_v29 = vld [vmem:[%s1784_s11 + $0xe8] sm:$0xff]  ;;  %429 = vst [vmem:[#allocation2 + $0x28] sm:$0xff] %v397_v27  ;;  %v400_v30 = vld [vmem:[%s1784_s11 + $0xf0] sm:$0xff] }
  0x7f   : > { %430 = vst [vmem:[#allocation2 + $0xa0] sm:$0xff] %v398_v28  ;;  %431 = vst [vmem:[#allocation2 + $0xf8] sm:$0xff] %v399_v29  ;;  %v401_v31 = vld [vmem:[%s1784_s11 + $0xf8] sm:$0xff] }
  0x80   : > { %432 = vst [vmem:[#allocation2 + $0x20] sm:$0xff] %v400_v30  ;;  %433 = vst [vmem:[#allocation2 + $0x98] sm:$0xff] %v401_v31 }
  0x81 PF: > { %v497_v32 = vld [vmem:[%s1792_s16 + $0xf8] sm:$0xff]  ;;  %v496_v34 = vld [vmem:[%s1792_s16 + $0xf0] sm:$0xff]  ;;  %v495_v36 = vld [vmem:[%s1792_s16 + $0xe8] sm:$0xff]  ;;  %p1124_p13 = scmp.ne.s32.totalorder %s1528_s24, 1 }
  0x82   : > { %v481_v33 = vld [vmem:[%s1792_s16 + $0x78] sm:$0xff]  ;;  %1137 = vmatprep.subr.mxu0 %v497_v32  ;;  %v480_v35 = vld [vmem:[%s1792_s16 + $0x70] sm:$0xff]  ;;  %v479_v37 = vld [vmem:[%s1792_s16 + $0x68] sm:$0xff] }
  0x83   : > { %1138 = vmatpush3.msra.mxu0 %v481_v33  ;;  %v494_v38 = vld [vmem:[%s1792_s16 + $0xe0] sm:$0xff]  ;;  %v493_v40 = vld [vmem:[%s1792_s16 + $0xd8] sm:$0xff]  ;;  %v492_v42 = vld [vmem:[%s1792_s16 + $0xd0] sm:$0xff] }
  0x84   : > { %1139 = vmatprep.subr.mxu0 %v496_v34  ;;  %v478_v39 = vld [vmem:[%s1792_s16 + $0x60] sm:$0xff]  ;;  %v477_v41 = vld [vmem:[%s1792_s16 + $0x58] sm:$0xff]  ;;  %v476_v43 = vld [vmem:[%s1792_s16 + $0x50] sm:$0xff] }
  0x85   : > { %1140 = vmatpush3.msra.mxu0 %v480_v35  ;;  %v491_v44 = vld [vmem:[%s1792_s16 + $0xc8] sm:$0xff]  ;;  %v435_v45 = vld [vmem:[#allocation2] sm:$0xff]  ;;  %v489_v49 = vld [vmem:[%s1792_s16 + $0xb8] sm:$0xff] }
  0x86   : > { %1141 = vmatprep.subr.mxu0 %v495_v36  ;;  %v475_v46 = vld [vmem:[%s1792_s16 + $0x48] sm:$0xff]  ;;  %569 = vmatprep.mubr.f32.mxu0 %v435_v45  ;;  %v490_v47 = vld [vmem:[%s1792_s16 + $0xc0] sm:$0xff]  ;;  %v473_v50 = vld [vmem:[%s1792_s16 + $0x38] sm:$0xff] }
  0x87   : > { %1142 = vmatpush3.msra.mxu0 %v479_v37  ;;  %v474_v48 = vld [vmem:[%s1792_s16 + $0x40] sm:$0xff]  ;;  %v488_v51 = vld [vmem:[%s1792_s16 + $0xb0] sm:$0xff]  ;;  %v487_v53 = vld [vmem:[%s1792_s16 + $0xa8] sm:$0xff] }
  0x88   : > { %1143 = vmatprep.subr.mxu0 %v494_v38  ;;  %v472_v52 = vld [vmem:[%s1792_s16 + $0x30] sm:$0xff]  ;;  %v471_v54 = vld [vmem:[%s1792_s16 + $0x28] sm:$0xff]  ;;  %v486_v55 = vld [vmem:[%s1792_s16 + $0xa0] sm:$0xff] }
  0x89   : > { %1144 = vmatpush3.msra.mxu0 %v478_v39  ;;  %v470_v56 = vld [vmem:[%s1792_s16 + $0x20] sm:$0xff]  ;;  %v697_v57 = vld [vmem:[%s1812_s12 + $0xf8] sm:$0xff]  ;;  %v696_v58 = vld [vmem:[%s1812_s12 + $0xf0] sm:$0xff] }
  0x8a   : > { %1145 = vmatprep.subr.mxu0 %v493_v40  ;;  %v485_v59 = vld [vmem:[%s1792_s16 + $0x98] sm:$0xff]  ;;  %710 = vmatprep.subr.mxu1 %v697_v57  ;;  %v695_v60 = vld [vmem:[%s1812_s12 + $0xe8] sm:$0xff]  ;;  %v694_v61 = vld [vmem:[%s1812_s12 + $0xe0] sm:$0xff] }
  0x8b   : > { %1146 = vmatpush3.msra.mxu0 %v477_v41  ;;  %v469_v62 = vld [vmem:[%s1792_s16 + $0x18] sm:$0xff]  ;;  %711 = vmatpush1.msra.mxu1 %v696_v58  ;;  %v484_v0 = vld [vmem:[%s1792_s16 + $0x90] sm:$0xff]  ;;  %v691_v3 = vld [vmem:[%s1812_s12 + $0xc8] sm:$0xff] }
  0x8c   : > { %1147 = vmatprep.subr.mxu0 %v492_v42  ;;  %v693_v63 = vld [vmem:[%s1812_s12 + $0xd8] sm:$0xff]  ;;  %712 = vmatprep.subr.mxu1 %v695_v60  ;;  %v692_v1 = vld [vmem:[%s1812_s12 + $0xd0] sm:$0xff]  ;;  %v483_v4 = vld [vmem:[%s1792_s16 + $0x88] sm:$0xff] }
  0x8d   : > { %1148 = vmatpush3.msra.mxu0 %v476_v43  ;;  %v468_v2 = vld [vmem:[%s1792_s16 + $0x10] sm:$0xff]  ;;  %713 = vmatpush1.msra.mxu1 %v694_v61  ;;  %v690_v5 = vld [vmem:[%s1812_s12 + $0xc0] sm:$0xff]  ;;  %v467_v6 = vld [vmem:[%s1792_s16 + $0x8] sm:$0xff] }
  0x8e   : > { %1149 = vmatprep.subr.mxu0 %v491_v44  ;;  %714 = vmatprep.subr.mxu1 %v693_v63  ;;  %v689_v7 = vld [vmem:[%s1812_s12 + $0xb8] sm:$0xff]  ;;  %v482_v8 = vld [vmem:[%s1792_s16 + $0x80] sm:$0xff]  ;;  %v688_v9 = vld [vmem:[%s1812_s12 + $0xb0] sm:$0xff] }
  0x8f   : > { %1150 = vmatpush3.msra.mxu0 %v475_v46  ;;  %715 = vmatpush1.msra.mxu1 %v692_v1  ;;  %v466_v10 = vld [vmem:[%s1792_s16] sm:$0xff]  ;;  %v687_v11 = vld [vmem:[%s1812_s12 + $0xa8] sm:$0xff]  ;;  %v434_v12 = vld [vmem:[#allocation2 + $0xb0] sm:$0xff] }
  0x90   : > { %1151 = vmatprep.subr.mxu0 %v490_v47  ;;  %716 = vmatprep.subr.mxu1 %v691_v3  ;;  %v686_v13 = vld [vmem:[%s1812_s12 + $0xa0] sm:$0xff]  ;;  %v437_v14 = vld [vmem:[#allocation2 + $0x18] sm:$0xff]  ;;  %v684_v16 = vld [vmem:[%s1812_s12 + $0x90] sm:$0xff] }
  0x91   : > { %1152 = vmatpush3.msra.mxu0 %v474_v48  ;;  %717 = vmatpush1.msra.mxu1 %v690_v5  ;;  %v685_v15 = vld [vmem:[%s1812_s12 + $0x98] sm:$0xff]  ;;  %v683_v17 = vld [vmem:[%s1812_s12 + $0x88] sm:$0xff]  ;;  %v682_v19 = vld [vmem:[%s1812_s12 + $0x80] sm:$0xff] }
  0x92   : > { %1153 = vmatprep.subr.mxu0 %v489_v49  ;;  %718 = vmatprep.subr.mxu1 %v689_v7  ;;  %v436_v18 = vld [vmem:[#allocation2 + $0xd8] sm:$0xff]  ;;  %v439_v20 = vld [vmem:[#allocation2 + $0x68] sm:$0xff]  ;;  %v680_v22 = vld [vmem:[%s1812_s12 + $0x70] sm:$0xff] }
  0x93   : > { %1154 = vmatpush3.msra.mxu0 %v473_v50  ;;  %719 = vmatpush1.msra.mxu1 %v688_v9  ;;  %v681_v21 = vld [vmem:[%s1812_s12 + $0x78] sm:$0xff]  ;;  %v679_v23 = vld [vmem:[%s1812_s12 + $0x68] sm:$0xff]  ;;  %v438_v24 = vld [vmem:[#allocation2 + $0x50] sm:$0xff] }
  0x94   : > { %1155 = vmatprep.subr.mxu0 %v488_v51  ;;  %720 = vmatprep.subr.mxu1 %v687_v11  ;;  %v678_v25 = vld [vmem:[%s1812_s12 + $0x60] sm:$0xff]  ;;  %v441_v26 = vld [vmem:[#allocation2 + $0x48] sm:$0xff]  ;;  %v677_v27 = vld [vmem:[%s1812_s12 + $0x58] sm:$0xff] }
  0x95   : > { %1156 = vmatpush3.msra.mxu0 %v472_v52  ;;  %721 = vmatpush1.msra.mxu1 %v686_v13  ;;  %v676_v28 = vld [vmem:[%s1812_s12 + $0x50] sm:$0xff]  ;;  %v675_v29 = vld [vmem:[%s1812_s12 + $0x48] sm:$0xff]  ;;  %v442_v32 = vld [vmem:[#allocation2 + $0x80] sm:$0xff] }
  0x96   : > { %1157 = vmatprep.subr.mxu0 %v487_v53  ;;  %722 = vmatprep.subr.mxu1 %v685_v15  ;;  %v440_v30 = vld [vmem:[#allocation2 + $0x30] sm:$0xff]  ;;  %v443_v31 = vld [vmem:[#allocation2 + $0x88] sm:$0xff]  ;;  %v445_v33 = vld [vmem:[#allocation2 + $0xb8] sm:$0xff] }
  0x97   : > { %1158 = vmatpush3.msra.mxu0 %v471_v54  ;;  %723 = vmatpush1.msra.mxu1 %v684_v16  ;;  %v444_v34 = vld [vmem:[#allocation2 + $0xe8] sm:$0xff]  ;;  %v447_v35 = vld [vmem:[#allocation2 + $0xf0] sm:$0xff]  ;;  %v446_v36 = vld [vmem:[#allocation2 + $0x60] sm:$0xff] }
  0x98   : > { %1159 = vmatprep.subr.mxu0 %v486_v55  ;;  %724 = vmatprep.subr.mxu1 %v683_v17  ;;  %v449_v37 = vld [vmem:[#allocation2 + $0x78] sm:$0xff]  ;;  %v448_v38 = vld [vmem:[#allocation2 + $0x8] sm:$0xff]  ;;  %v452_v42 = vld [vmem:[#allocation2 + $0x40] sm:$0xff] }
  0x99   : > { %1160 = vmatpush3.msra.mxu0 %v470_v56  ;;  %725 = vmatpush1.msra.mxu1 %v682_v19  ;;  %v451_v39 = vld [vmem:[#allocation2 + $0x58] sm:$0xff]  ;;  %v453_v41 = vld [vmem:[#allocation2 + $0xc8] sm:$0xff]  ;;  %v455_v43 = vld [vmem:[#allocation2 + $0x90] sm:$0xff] }
  0x9a   : > { %1161 = vmatprep.subr.mxu0 %v485_v59  ;;  %726 = vmatprep.subr.mxu1 %v681_v21  ;;  %v450_v40 = vld [vmem:[#allocation2 + $0x38] sm:$0xff]  ;;  %v454_v44 = vld [vmem:[#allocation2 + $0xe0] sm:$0xff]  ;;  %v456_v46 = vld [vmem:[#allocation2 + $0x70] sm:$0xff] }
  0x9b   : > { %1162 = vmatpush3.msra.mxu0 %v469_v62  ;;  %727 = vmatpush1.msra.mxu1 %v680_v22  ;;  %v457_v45 = vld [vmem:[#allocation2 + $0xc0] sm:$0xff]  ;;  %v459_v47 = vld [vmem:[#allocation2 + $0xd0] sm:$0xff]  ;;  %v458_v48 = vld [vmem:[#allocation2 + $0xa8] sm:$0xff] }
  0x9c   : > { %1163 = vmatprep.subr.mxu0 %v484_v0  ;;  %728 = vmatprep.subr.mxu1 %v679_v23  ;;  %v461_v49 = vld [vmem:[#allocation2 + $0x28] sm:$0xff]  ;;  %v460_v50 = vld [vmem:[#allocation2 + $0x10] sm:$0xff]  ;;  %v463_v51 = vld [vmem:[#allocation2 + $0xf8] sm:$0xff]  ;;  %v1553_v0 = vmov 0.0  }
  0x9d   : > { %1164 = vmatpush3.msra.mxu0 %v468_v2  ;;  %729 = vmatpush1.msra.mxu1 %v678_v25  ;;  %v462_v52 = vld [vmem:[#allocation2 + $0xa0] sm:$0xff]  ;;  %v465_v53 = vld [vmem:[#allocation2 + $0x98] sm:$0xff]  ;;  %v672_v57 = vld [vmem:[%s1812_s12 + $0x30] sm:$0xff] }
  0x9e   : > { %1165 = vmatprep.subr.mxu0 %v483_v4  ;;  %730 = vmatprep.subr.mxu1 %v677_v27  ;;  %v464_v54 = vld [vmem:[#allocation2 + $0x20] sm:$0xff]  ;;  %v673_v56 = vld [vmem:[%s1812_s12 + $0x38] sm:$0xff]  ;;  %v671_v58 = vld [vmem:[%s1812_s12 + $0x28] sm:$0xff] }
  0x9f   : > { %1166 = vmatpush3.msra.mxu0 %v467_v6  ;;  %731 = vmatpush1.msra.mxu1 %v676_v28  ;;  %v674_v55 = vld [vmem:[%s1812_s12 + $0x40] sm:$0xff]  ;;  %v669_v60 = vld [vmem:[%s1812_s12 + $0x18] sm:$0xff]  ;;  %v668_v61 = vld [vmem:[%s1812_s12 + $0x10] sm:$0xff] }
  0xa0   : > { %1167 = vmatprep.subr.mxu0 %v482_v8  ;;  %732 = vmatprep.subr.mxu1 %v675_v29  ;;  %v670_v59 = vld [vmem:[%s1812_s12 + $0x20] sm:$0xff]  ;;  %v667_v62 = vld [vmem:[%s1812_s12 + $0x8] sm:$0xff] }
  0xa1   : > { %1168 = vmatpush3.msra.mxu0 %v466_v10  ;;  %733 = vmatpush1.msra.mxu1 %v674_v55  ;;  %v666_v63 = vld [vmem:[%s1812_s12] sm:$0xff] }
  0xa2   : > { %570 = vmatmul.mubr.f32.vlgmr.msra.gmra.mxu0 %v434_v12  ;;  %734 = vmatprep.subr.mxu1 %v673_v56  ;;  %v1919_v2 = vld [vmem:[%s360_s29] ss:$0 sm:$0xff] }
  0xa3   : > { %574 = vmatprep.mubr.f32.mxu0 %v437_v14  ;;  %735 = vmatpush1.msra.mxu1 %v672_v57 }
  0xa4   : > { %736 = vmatprep.subr.mxu1 %v671_v58  ;;  %774 = vmatprep.mubr.f32.mxu1 %v1553_v0 }
  0xa5   : > { %737 = vmatpush1.msra.mxu1 %v670_v59 }
  0xa6   : > { %575 = vmatmul.mubr.f32.gmra.mxu0 %v436_v18  ;;  %738 = vmatprep.subr.mxu1 %v669_v60 }
  0xa7   : > { %579 = vmatprep.mubr.f32.mxu0 %v439_v20  ;;  %739 = vmatpush1.msra.mxu1 %v668_v61 }
  0xa8   : > { %740 = vmatprep.subr.mxu1 %v667_v62 }
  0xa9   : > { %741 = vmatpush1.msra.mxu1 %v666_v63 }
  0xaa   : > { %580 = vmatmul.mubr.f32.gmra.mxu0 %v438_v24 }
  0xab   : > { %584 = vmatprep.mubr.f32.mxu0 %v441_v26 }
  0xae   : > { %585 = vmatmul.mubr.f32.gmra.mxu0 %v440_v30 }
  0xaf   : > { %589 = vmatprep.mubr.f32.mxu0 %v443_v31 }
  0xb2   : > { %590 = vmatmul.mubr.f32.gmra.mxu0 %v442_v32 }
  0xb3   : > { %594 = vmatprep.mubr.f32.mxu0 %v445_v33 }
  0xb6   : > { %595 = vmatmul.mubr.f32.gmra.mxu0 %v444_v34 }
  0xb7   : > { %599 = vmatprep.mubr.f32.mxu0 %v447_v35 }
  0xba   : > { %600 = vmatmul.mubr.f32.gmra.mxu0 %v446_v36 }
  0xbb   : > { %604 = vmatprep.mubr.f32.mxu0 %v449_v37 }
  0xbe   : > { %605 = vmatmul.mubr.f32.gmra.mxu0 %v448_v38 }
  0xbf   : > { %609 = vmatprep.mubr.f32.mxu0 %v451_v39 }
  0xc2   : > { %610 = vmatmul.mubr.f32.gmra.mxu0 %v450_v40 }
  0xc3   : > { %614 = vmatprep.mubr.f32.mxu0 %v453_v41 }
  0xc6   : > { %615 = vmatmul.mubr.f32.gmra.mxu0 %v452_v42 }
  0xc7   : > { %619 = vmatprep.mubr.f32.mxu0 %v455_v43 }
  0xca   : > { %620 = vmatmul.mubr.f32.gmra.mxu0 %v454_v44 }
  0xcb   : > { %624 = vmatprep.mubr.f32.mxu0 %v457_v45 }
  0xce   : > { %625 = vmatmul.mubr.f32.gmra.mxu0 %v456_v46 }
  0xcf   : > { %629 = vmatprep.mubr.f32.mxu0 %v459_v47 }
  0xd2   : > { %630 = vmatmul.mubr.f32.gmra.mxu0 %v458_v48 }
  0xd3   : > { %634 = vmatprep.mubr.f32.mxu0 %v461_v49 }
  0xd6   : > { %635 = vmatmul.mubr.f32.gmra.mxu0 %v460_v50 }
  0xd7   : > { %639 = vmatprep.mubr.f32.mxu0 %v463_v51 }
  0xda   : > { %640 = vmatmul.mubr.f32.gmra.mxu0 %v462_v52 }
  0xdb   : > { %644 = vmatprep.mubr.f32.mxu0 %v465_v53 }
  0xde   : > { %645 = vmatmul.mubr.f32.gmra.mxu0 %v464_v54 }
 0x162   : > { %v1169_v1 = vpop.f32.mrf.mxu0 }
 0x164   : > { %v1170_v3 = vpop.f32.mrf.mxu0 }
 0x165   : > { %v1171_v4 = vadd.f32 %v1170_v3, %v1169_v1 }
 0x166   : > { %v1172_v5 = vpop.f32.mrf.mxu0 }
 0x167   : > { %v572_v6 = vadd.f32 %v1171_v4, %v1919_v2 }
 0x168   : > { %v1173_v7 = vpop.f32.mrf.mxu0 }
 0x169   : > { %v650_v8 = vmax.f32 %v572_v6, 0.0  ;;  %v1174_v9 = vadd.f32 %v1173_v7, %v1172_v5 }
 0x16a   : > { %v1175_v10 = vpop.f32.mrf.mxu0 }
 0x16b   : > { %v577_v11 = vadd.f32 %v1174_v9, %v1919_v2  ;;  %775 = vmatmul.mubr.f32.vlgmr.msra.gmra.mxu1 %v650_v8 }
 0x16c   : > { %v1176_v12 = vpop.f32.mrf.mxu0  ;;  %780 = vmatprep.mubr.f32.mxu1 %v1553_v0 }
 0x16d   : > { %v651_v13 = vmax.f32 %v577_v11, 0.0  ;;  %v1177_v14 = vadd.f32 %v1176_v12, %v1175_v10 }
 0x16e   : > { %v1178_v15 = vpop.f32.mrf.mxu0 }
 0x16f   : > { %v582_v16 = vadd.f32 %v1177_v14, %v1919_v2  ;;  %781 = vmatmul.mubr.f32.gmra.mxu1 %v651_v13 }
 0x170   : > { %v1179_v17 = vpop.f32.mrf.mxu0  ;;  %786 = vmatprep.mubr.f32.mxu1 %v1553_v0 }
 0x171   : > { %v652_v18 = vmax.f32 %v582_v16, 0.0  ;;  %v1180_v19 = vadd.f32 %v1179_v17, %v1178_v15 }
 0x172   : > { %v1181_v20 = vpop.f32.mrf.mxu0 }
 0x173   : > { %v587_v21 = vadd.f32 %v1180_v19, %v1919_v2  ;;  %787 = vmatmul.mubr.f32.gmra.mxu1 %v652_v18 }
 0x174   : > { %v1182_v22 = vpop.f32.mrf.mxu0  ;;  %792 = vmatprep.mubr.f32.mxu1 %v1553_v0 }
 0x175   : > { %v653_v23 = vmax.f32 %v587_v21, 0.0  ;;  %v1183_v24 = vadd.f32 %v1182_v22, %v1181_v20  ;;  %v700_v20 = vlaneseq }
 0x176   : > { %v1184_v25 = vpop.f32.mrf.mxu0 }
 0x177   : > { %v592_v26 = vadd.f32 %v1183_v24, %v1919_v2  ;;  %793 = vmatmul.mubr.f32.gmra.mxu1 %v653_v23  ;;  %v701_v21 = vshrl.u32 %v700_v20, 7  ;;  %v698_v23 = vld [vmem:[%s1810_s13] sm:$0x3] }
 0x178   : > { %v1185_v27 = vpop.f32.mrf.mxu0  ;;  %798 = vmatprep.mubr.f32.mxu1 %v1553_v0 }
 0x179   : > { %v654_v28 = vmax.f32 %v592_v26, 0.0  ;;  %v1186_v29 = vadd.f32 %v1185_v27, %v1184_v25  ;;  %v702_v22 = vsub.s32 0, %v701_v21  ;;  %v706_v24 = vsub.s32 1, %v701_v21 }
 0x17a   : > { %v1187_v30 = vpop.f32.mrf.mxu0 }
 0x17b   : > { %v597_v31 = vadd.f32 %v1186_v29, %v1919_v2  ;;  %799 = vmatmul.mubr.f32.gmra.mxu1 %v654_v28  ;;  %v1953_v25 = vrot.slane %v698_v23, %v702_v22  ;;  %v1955_v26 = vrot.slane %v698_v23, %v706_v24 }
 0x17c   : > { %v1188_v32 = vpop.f32.mrf.mxu0  ;;  %804 = vmatprep.mubr.f32.mxu1 %v1553_v0 }
 0x17d   : > { %v655_v33 = vmax.f32 %v597_v31, 0.0  ;;  %v1189_v34 = vadd.f32 %v1188_v32, %v1187_v30 }
 0x17e   : > { %v1190_v35 = vpop.f32.mrf.mxu0 }
 0x17f   : > { %v602_v36 = vadd.f32 %v1189_v34, %v1919_v2  ;;  %805 = vmatmul.mubr.f32.gmra.mxu1 %v655_v33 }
 0x180   : > { %v1191_v37 = vpop.f32.mrf.mxu0  ;;  %810 = vmatprep.mubr.f32.mxu1 %v1553_v0 }
 0x181   : > { %v656_v38 = vmax.f32 %v602_v36, 0.0  ;;  %v1192_v39 = vadd.f32 %v1191_v37, %v1190_v35 }
 0x182   : > { %v1193_v40 = vpop.f32.mrf.mxu0 }
 0x183   : > { %v607_v41 = vadd.f32 %v1192_v39, %v1919_v2  ;;  %811 = vmatmul.mubr.f32.gmra.mxu1 %v656_v38 }
 0x184   : > { %v1194_v42 = vpop.f32.mrf.mxu0  ;;  %816 = vmatprep.mubr.f32.mxu1 %v1553_v0 }
 0x185   : > { %v657_v43 = vmax.f32 %v607_v41, 0.0  ;;  %v1195_v44 = vadd.f32 %v1194_v42, %v1193_v40 }
 0x186   : > { %v1196_v45 = vpop.f32.mrf.mxu0 }
 0x187   : > { %v612_v46 = vadd.f32 %v1195_v44, %v1919_v2  ;;  %817 = vmatmul.mubr.f32.gmra.mxu1 %v657_v43 }
 0x188   : > { %v1197_v47 = vpop.f32.mrf.mxu0  ;;  %822 = vmatprep.mubr.f32.mxu1 %v1553_v0 }
 0x189   : > { %v658_v48 = vmax.f32 %v612_v46, 0.0  ;;  %v1198_v49 = vadd.f32 %v1197_v47, %v1196_v45 }
 0x18a   : > { %v1199_v50 = vpop.f32.mrf.mxu0 }
 0x18b   : > { %v617_v51 = vadd.f32 %v1198_v49, %v1919_v2  ;;  %823 = vmatmul.mubr.f32.gmra.mxu1 %v658_v48 }
 0x18c   : > { %v1200_v52 = vpop.f32.mrf.mxu0  ;;  %828 = vmatprep.mubr.f32.mxu1 %v1553_v0 }
 0x18d   : > { %v659_v53 = vmax.f32 %v617_v51, 0.0  ;;  %v1201_v54 = vadd.f32 %v1200_v52, %v1199_v50 }
 0x18e   : > { %v1202_v55 = vpop.f32.mrf.mxu0 }
 0x18f   : > { %v622_v56 = vadd.f32 %v1201_v54, %v1919_v2  ;;  %829 = vmatmul.mubr.f32.gmra.mxu1 %v659_v53 }
 0x190   : > { %v1203_v57 = vpop.f32.mrf.mxu0  ;;  %834 = vmatprep.mubr.f32.mxu1 %v1553_v0 }
 0x191   : > { %v660_v58 = vmax.f32 %v622_v56, 0.0  ;;  %v1204_v59 = vadd.f32 %v1203_v57, %v1202_v55 }
 0x192   : > { %v1205_v60 = vpop.f32.mrf.mxu0 }
 0x193   : > { %v627_v61 = vadd.f32 %v1204_v59, %v1919_v2  ;;  %835 = vmatmul.mubr.f32.gmra.mxu1 %v660_v58 }
 0x194   : > { %v1206_v62 = vpop.f32.mrf.mxu0  ;;  %840 = vmatprep.mubr.f32.mxu1 %v1553_v0 }
 0x195   : > { %v661_v63 = vmax.f32 %v627_v61, 0.0  ;;  %v1207_v1 = vadd.f32 %v1206_v62, %v1205_v60 }
 0x196   : > { %v1208_v3 = vpop.f32.mrf.mxu0 }
 0x197   : > { %v632_v4 = vadd.f32 %v1207_v1, %v1919_v2  ;;  %841 = vmatmul.mubr.f32.gmra.mxu1 %v661_v63 }
 0x198   : > { %v1209_v5 = vpop.f32.mrf.mxu0  ;;  %846 = vmatprep.mubr.f32.mxu1 %v1553_v0 }
 0x199   : > { %v662_v6 = vmax.f32 %v632_v4, 0.0  ;;  %v1210_v7 = vadd.f32 %v1209_v5, %v1208_v3 }
 0x19a   : > { %v1211_v8 = vpop.f32.mrf.mxu0 }
 0x19b   : > { %v637_v9 = vadd.f32 %v1210_v7, %v1919_v2  ;;  %847 = vmatmul.mubr.f32.gmra.mxu1 %v662_v6 }
 0x19c   : > { %v1212_v10 = vpop.f32.mrf.mxu0  ;;  %852 = vmatprep.mubr.f32.mxu1 %v1553_v0 }
 0x19d   : > { %v663_v11 = vmax.f32 %v637_v9, 0.0  ;;  %v1213_v12 = vadd.f32 %v1212_v10, %v1211_v8 }
 0x19e   : > { %v1214_v13 = vpop.f32.mrf.mxu0 }
 0x19f   : > { %v642_v14 = vadd.f32 %v1213_v12, %v1919_v2  ;;  %853 = vmatmul.mubr.f32.gmra.mxu1 %v663_v11 }
 0x1a0   : > { %v1215_v15 = vpop.f32.mrf.mxu0  ;;  %858 = vmatprep.mubr.f32.mxu1 %v1553_v0 }
 0x1a1   : > { %v664_v16 = vmax.f32 %v642_v14, 0.0  ;;  %v1216_v17 = vadd.f32 %v1215_v15, %v1214_v13 }
 0x1a3   : > { %v647_v18 = vadd.f32 %v1216_v17, %v1919_v2  ;;  %859 = vmatmul.mubr.f32.gmra.mxu1 %v664_v16 }
 0x1a4   : > { %864 = vmatprep.mubr.f32.mxu1 %v1553_v0 }
 0x1a5   : > { %v665_v19 = vmax.f32 %v647_v18, 0.0 }
 0x1a7   : > { %865 = vmatmul.mubr.f32.gmra.mxu1 %v665_v19 }
 0x22b   : > { %v776_v27 = vpop.f32.mrf.mxu1 }
 0x22c   : > { %v1958_v28 = vadd.f32 %v776_v27, %v1953_v25 }
 0x22d   : > { %v778_v29 = vpop.f32.mrf.mxu1 }
 0x22e   : > { %871 = vst [vmem:[#allocation2 + $0xb0] sm:$0xff] %v1958_v28  ;;  %v1962_v0 = vadd.f32 %v778_v29, %v1955_v26 }
 0x22f   : > { %v782_v2 = vpop.f32.mrf.mxu1 }
 0x230   : > { %872 = vst [vmem:[#allocation2] sm:$0xff] %v1962_v0  ;;  %v1966_v30 = vadd.f32 %v782_v2, %v1953_v25 }
 0x231   : > { %v784_v31 = vpop.f32.mrf.mxu1 }
 0x232   : > { %873 = vst [vmem:[#allocation2 + $0xd8] sm:$0xff] %v1966_v30  ;;  %v1970_v32 = vadd.f32 %v784_v31, %v1955_v26 }
 0x233   : > { %v788_v33 = vpop.f32.mrf.mxu1 }
 0x234   : > { %874 = vst [vmem:[#allocation2 + $0x18] sm:$0xff] %v1970_v32  ;;  %v1974_v34 = vadd.f32 %v788_v33, %v1953_v25 }
 0x235   : > { %v790_v35 = vpop.f32.mrf.mxu1 }
 0x236   : > { %875 = vst [vmem:[#allocation2 + $0x50] sm:$0xff] %v1974_v34  ;;  %v1978_v36 = vadd.f32 %v790_v35, %v1955_v26 }
 0x237   : > { %v794_v37 = vpop.f32.mrf.mxu1 }
 0x238   : > { %876 = vst [vmem:[#allocation2 + $0x68] sm:$0xff] %v1978_v36  ;;  %v1982_v38 = vadd.f32 %v794_v37, %v1953_v25 }
 0x239   : > { %v796_v39 = vpop.f32.mrf.mxu1 }
 0x23a   : > { %877 = vst [vmem:[#allocation2 + $0x30] sm:$0xff] %v1982_v38  ;;  %v1986_v40 = vadd.f32 %v796_v39, %v1955_v26 }
 0x23b   : > { %v800_v41 = vpop.f32.mrf.mxu1 }
 0x23c   : > { %878 = vst [vmem:[#allocation2 + $0x48] sm:$0xff] %v1986_v40  ;;  %v1990_v42 = vadd.f32 %v800_v41, %v1953_v25 }
 0x23d   : > { %v802_v43 = vpop.f32.mrf.mxu1 }
 0x23e   : > { %879 = vst [vmem:[#allocation2 + $0x80] sm:$0xff] %v1990_v42  ;;  %v1994_v44 = vadd.f32 %v802_v43, %v1955_v26 }
 0x23f   : > { %v806_v45 = vpop.f32.mrf.mxu1 }
 0x240   : > { %880 = vst [vmem:[#allocation2 + $0x88] sm:$0xff] %v1994_v44  ;;  %v1998_v46 = vadd.f32 %v806_v45, %v1953_v25 }
 0x241   : > { %v808_v47 = vpop.f32.mrf.mxu1 }
 0x242   : > { %881 = vst [vmem:[#allocation2 + $0xe8] sm:$0xff] %v1998_v46  ;;  %v2002_v48 = vadd.f32 %v808_v47, %v1955_v26 }
 0x243   : > { %v812_v49 = vpop.f32.mrf.mxu1 }
 0x244   : > { %882 = vst [vmem:[#allocation2 + $0xb8] sm:$0xff] %v2002_v48  ;;  %v2006_v50 = vadd.f32 %v812_v49, %v1953_v25 }
 0x245   : > { %v814_v51 = vpop.f32.mrf.mxu1 }
 0x246   : > { %883 = vst [vmem:[#allocation2 + $0x60] sm:$0xff] %v2006_v50  ;;  %v2010_v52 = vadd.f32 %v814_v51, %v1955_v26 }
 0x247   : > { %v818_v53 = vpop.f32.mrf.mxu1 }
 0x248   : > { %884 = vst [vmem:[#allocation2 + $0xf0] sm:$0xff] %v2010_v52  ;;  %v2014_v54 = vadd.f32 %v818_v53, %v1953_v25 }
 0x249   : > { %v820_v55 = vpop.f32.mrf.mxu1 }
 0x24a   : > { %885 = vst [vmem:[#allocation2 + $0x8] sm:$0xff] %v2014_v54  ;;  %v2018_v56 = vadd.f32 %v820_v55, %v1955_v26 }
 0x24b   : > { %v824_v57 = vpop.f32.mrf.mxu1 }
 0x24c   : > { %886 = vst [vmem:[#allocation2 + $0x78] sm:$0xff] %v2018_v56  ;;  %v2022_v58 = vadd.f32 %v824_v57, %v1953_v25 }
 0x24d   : > { %v826_v59 = vpop.f32.mrf.mxu1 }
 0x24e   : > { %887 = vst [vmem:[#allocation2 + $0x38] sm:$0xff] %v2022_v58  ;;  %v827_v60 = vadd.f32 %v826_v59, %v1955_v26 }
 0x24f   : > { %v830_v61 = vpop.f32.mrf.mxu1 }
 0x250   : > { %888 = vst [vmem:[#allocation2 + $0x58] sm:$0xff] %v827_v60  ;;  %v831_v62 = vadd.f32 %v830_v61, %v1953_v25 }
 0x251   : > { %v832_v63 = vpop.f32.mrf.mxu1 }
 0x252   : > { %889 = vst [vmem:[#allocation2 + $0x40] sm:$0xff] %v831_v62  ;;  %v833_v1 = vadd.f32 %v832_v63, %v1955_v26 }
 0x253   : > { %v836_v3 = vpop.f32.mrf.mxu1 }
 0x254   : > { %890 = vst [vmem:[#allocation2 + $0xc8] sm:$0xff] %v833_v1  ;;  %v837_v4 = vadd.f32 %v836_v3, %v1953_v25 }
 0x255   : > { %v838_v5 = vpop.f32.mrf.mxu1 }
 0x256   : > { %891 = vst [vmem:[#allocation2 + $0xe0] sm:$0xff] %v837_v4  ;;  %v839_v6 = vadd.f32 %v838_v5, %v1955_v26 }
 0x257   : > { %v842_v7 = vpop.f32.mrf.mxu1 }
 0x258   : > { %892 = vst [vmem:[#allocation2 + $0x90] sm:$0xff] %v839_v6  ;;  %v843_v8 = vadd.f32 %v842_v7, %v1953_v25 }
 0x259   : > { %v844_v9 = vpop.f32.mrf.mxu1 }
 0x25a   : > { %893 = vst [vmem:[#allocation2 + $0x70] sm:$0xff] %v843_v8  ;;  %v845_v10 = vadd.f32 %v844_v9, %v1955_v26 }
 0x25b   : > { %v848_v11 = vpop.f32.mrf.mxu1 }
 0x25c   : > { %894 = vst [vmem:[#allocation2 + $0xc0] sm:$0xff] %v845_v10  ;;  %v849_v12 = vadd.f32 %v848_v11, %v1953_v25 }
 0x25d   : > { %v850_v13 = vpop.f32.mrf.mxu1 }
 0x25e   : > { %895 = vst [vmem:[#allocation2 + $0xa8] sm:$0xff] %v849_v12  ;;  %v851_v14 = vadd.f32 %v850_v13, %v1955_v26 }
 0x25f   : > { %v854_v15 = vpop.f32.mrf.mxu1 }
 0x260   : > { %896 = vst [vmem:[#allocation2 + $0xd0] sm:$0xff] %v851_v14  ;;  %v855_v16 = vadd.f32 %v854_v15, %v1953_v25 }
 0x261   : > { %v856_v17 = vpop.f32.mrf.mxu1 }
 0x262   : > { %897 = vst [vmem:[#allocation2 + $0x10] sm:$0xff] %v855_v16  ;;  %v857_v18 = vadd.f32 %v856_v17, %v1955_v26 }
 0x263   : > { %v860_v19 = vpop.f32.mrf.mxu1 }
 0x264   : > { %898 = vst [vmem:[#allocation2 + $0x28] sm:$0xff] %v857_v18  ;;  %v861_v20 = vadd.f32 %v860_v19, %v1953_v25 }
 0x265   : > { %v862_v21 = vpop.f32.mrf.mxu1 }
 0x266   : > { %899 = vst [vmem:[#allocation2 + $0xa0] sm:$0xff] %v861_v20  ;;  %v863_v22 = vadd.f32 %v862_v21, %v1955_v26 }
 0x267   : > { %v866_v23 = vpop.f32.mrf.mxu1 }
 0x268   : > { %900 = vst [vmem:[#allocation2 + $0xf8] sm:$0xff] %v863_v22  ;;  %v867_v24 = vadd.f32 %v866_v23, %v1953_v25  ;;  %906 = sbr.rel (%p1124_p13) target bundleno = 637 (0x27d), region = 60 }
 0x269   : > { %v868_v27 = vpop.f32.mrf.mxu1 }
 0x26a   : > { %901 = vst [vmem:[#allocation2 + $0x20] sm:$0xff] %v867_v24  ;;  %v869_v29 = vadd.f32 %v868_v27, %v1955_v26 }
 0x26c   : > { %902 = vst [vmem:[#allocation2 + $0x98] sm:$0xff] %v869_v29 }
 0x26d   : > { %907 = vst [vmem:[%s1814_s9] sm:$0xff] %v1958_v28  ;;  %908 = vst [vmem:[%s1814_s9 + $0x8] sm:$0xff] %v1962_v0 }
 0x26e   : > { %909 = vst [vmem:[%s1814_s9 + $0x10] sm:$0xff] %v1966_v30  ;;  %910 = vst [vmem:[%s1814_s9 + $0x18] sm:$0xff] %v1970_v32 }
 0x26f   : > { %911 = vst [vmem:[%s1814_s9 + $0x20] sm:$0xff] %v1974_v34  ;;  %912 = vst [vmem:[%s1814_s9 + $0x28] sm:$0xff] %v1978_v36 }
 0x270   : > { %913 = vst [vmem:[%s1814_s9 + $0x30] sm:$0xff] %v1982_v38  ;;  %914 = vst [vmem:[%s1814_s9 + $0x38] sm:$0xff] %v1986_v40 }
 0x271   : > { %915 = vst [vmem:[%s1814_s9 + $0x40] sm:$0xff] %v1990_v42  ;;  %916 = vst [vmem:[%s1814_s9 + $0x48] sm:$0xff] %v1994_v44 }
 0x272   : > { %917 = vst [vmem:[%s1814_s9 + $0x50] sm:$0xff] %v1998_v46  ;;  %918 = vst [vmem:[%s1814_s9 + $0x58] sm:$0xff] %v2002_v48 }
 0x273   : > { %919 = vst [vmem:[%s1814_s9 + $0x60] sm:$0xff] %v2006_v50  ;;  %920 = vst [vmem:[%s1814_s9 + $0x68] sm:$0xff] %v2010_v52 }
 0x274   : > { %921 = vst [vmem:[%s1814_s9 + $0x70] sm:$0xff] %v2014_v54  ;;  %922 = vst [vmem:[%s1814_s9 + $0x78] sm:$0xff] %v2018_v56 }
 0x275   : > { %923 = vst [vmem:[%s1814_s9 + $0x80] sm:$0xff] %v2022_v58  ;;  %924 = vst [vmem:[%s1814_s9 + $0x88] sm:$0xff] %v827_v60 }
 0x276   : > { %925 = vst [vmem:[%s1814_s9 + $0x90] sm:$0xff] %v831_v62  ;;  %926 = vst [vmem:[%s1814_s9 + $0x98] sm:$0xff] %v833_v1 }
 0x277   : > { %927 = vst [vmem:[%s1814_s9 + $0xa0] sm:$0xff] %v837_v4  ;;  %928 = vst [vmem:[%s1814_s9 + $0xa8] sm:$0xff] %v839_v6 }
 0x278   : > { %929 = vst [vmem:[%s1814_s9 + $0xb0] sm:$0xff] %v843_v8  ;;  %930 = vst [vmem:[%s1814_s9 + $0xb8] sm:$0xff] %v845_v10 }
 0x279   : > { %931 = vst [vmem:[%s1814_s9 + $0xc0] sm:$0xff] %v849_v12  ;;  %932 = vst [vmem:[%s1814_s9 + $0xc8] sm:$0xff] %v851_v14 }
 0x27a   : > { %933 = vst [vmem:[%s1814_s9 + $0xd0] sm:$0xff] %v855_v16  ;;  %934 = vst [vmem:[%s1814_s9 + $0xd8] sm:$0xff] %v857_v18 }
 0x27b   : > { %935 = vst [vmem:[%s1814_s9 + $0xe0] sm:$0xff] %v861_v20  ;;  %936 = vst [vmem:[%s1814_s9 + $0xe8] sm:$0xff] %v863_v22 }
 0x27c   : > { %937 = vst [vmem:[%s1814_s9 + $0xf0] sm:$0xff] %v867_v24  ;;  %938 = vst [vmem:[%s1814_s9 + $0xf8] sm:$0xff] %v869_v29 }
 0x27d PF: > { %s2202_s24 = sld [smem:[#allocation15_spill]]  ;;  %s954_s14 = sshll.u32 %s1814_s9, 4  ;;  %s2097_s14 = int_to_ptr.vmem [resolvable:$true] %s954_s14 }
 0x27e   : > { %s2203_s7 = sld [smem:[#allocation24_spill]]  ;;  %s940_s6 = scalar_lea.sflag [#allocation5], %s1780_s2 }
 0x27f   : > { %s1420_s5 = scalar_lea.vmem %s2097_s14, 4096  ;;  %p2204_p3 = scmp.ne.s32.totalorder %s2194_s8, 0 }
 0x280   : > { %p1421_p12 = scmp.ne.s32.totalorder %s2097_s14, %s1420_s5  ;;  %s1554_s3 = smov [#allocation9]  }
 0x281   : > { %s1424_s29 = sshll.u32 %s1554_s3, 4  ;;  %s1425_s29 = int_to_ptr.vmem [resolvable:$false] %s1424_s29 }
 0x282   : > { %p1422_p6 = pnand %p1421_p12, %p2204_p3  ;;  %s1426_s4 = scalar_lea.vmem %s1425_s29, 8192 }
 0x283   : > { %s1136_s26 = sshll.u32 %s2202_s24, 12  ;;  %p1427_p10 = scmp.lt.s32.totalorder %s2097_s14, %s1425_s29 }
 0x284   : > { %s2094_s16 = scalar_lea.hbm %s2203_s7, %s1136_s26  ;;  %p1423_p2 = pneg %p1422_p6 }
 0x285   : > { %p1428_p4 = scmp.lt.s32.totalorder %s1426_s4, %s1420_s5 }
 0x287   : > { %p1429_p5 = por %p1428_p4, %p1427_p10 }
 0x289   : > { %p1430_p8 = pnand %p1429_p5, %p1423_p2 }
 0x28b   : > { %1433 = shalt.err (!%p1430_p8)
}
 0x28c   : > { %s1434_s20 = scalar_lea.hbm %s2094_s16, 4096  ;;  %s1438_s13 = scalar_lea.hbm %s2203_s7, 8192 }
 0x28d   : > { %p1435_p0 = scmp.ne.s32.totalorder %s2094_s16, %s1434_s20  ;;  %p1439_p9 = scmp.lt.s32.totalorder %s2094_s16, %s2203_s7 }
 0x28e   : > { %p1440_p7 = scmp.lt.s32.totalorder %s1438_s13, %s1434_s20 }
 0x28f   : > { %p1436_p11 = pnand %p1435_p0, %p2204_p3 }
 0x290   : > { %p1441_p13 = por %p1440_p7, %p1439_p9 }
 0x291   : > { %p1437_p1 = pneg %p1436_p11 }
 0x293   : > { %p1442_p12 = pnand %p1441_p13, %p1437_p1 }
 0x295   : > { %1445 = shalt.err (!%p1442_p12)
}
 0x296   : > { %s1555_s25 = smov 256   ;;  %s1556_s1 = smov 16  }
 0x297   : > { %1223 = dma.vmem_to_hbm [thread:$0]  (%p2204_p3), %s2097_s14, 4096, %s2094_s16, %s940_s6, %s1555_s25, %s1555_s25, %s1556_s1  }
 0x298 PF: > { %s2205_s11 = sld [smem:[#allocation14_spill]]  ;;  %p1240_p6 = scmp.ge.s32.totalorder %s1544_s28, 2 }
 0x299   : > { %p2206_p2 = scmp.ne.s32.totalorder %s2195_s15, 0 }
 0x29b   : > { %p1236_p10 = pnand %p1240_p6, %p2206_p2 }
 0x29d   : > { %p1237_p4 = pneg %p1236_p10 }
 0x29e   : > { %s969_s24 = sand.u32 1, %s2205_s11  }
 0x29f   : > { %s970_s26 = scalar_lea.sflag [#allocation5], %s969_s24 }
 0x2a0   : > { %1499 = dma.done.wait (%p1237_p4), %s970_s26, 4096  }
 0x2a1   : > { %1501 = vsyncadd (%p1237_p4), %s970_s26, 4294963200  ;;  %s24_s28 = sadd.s32 1, %s1544_s28   ;;  %s2207_s30 = sld [smem:[#allocation13_spill]] }
 0x2a2   : > { %p21_p5 = scmp.ge.s32.totalorder %s24_s28, 6   ;;  %s2208_s20 = sld [smem:[#allocation18_spill]] }
 0x2a3   : > { %s2209_s8 = smov %s1748_s18  ;;  %s2210_s24 = sld [smem:[#allocation16_spill]] }
 0x2a4   : > { %s2211_s26 = sld [smem:[#allocation17_spill]]  ;;  %s2213_s18 = smov %s1508_s19 }
 0x2a5   : > { %s2212_s2 = sld [smem:[#allocation19_spill]]  ;;  %s2215_s21 = smov %s1520_s22 }
 0x2a6   : > { %s2216_s22 = smov %s1524_s23  ;;  %s2217_s23 = smov %s2209_s8 }
 0x2a7   : > { %s2214_s19 = smov %s2207_s30  ;;  %s2218_s25 = smov %s1540_s27 }
 0x2a8   :  { %23 = sbr.rel (!%p21_p5) target bundleno = 17 (0x11), region = 123 }
 0x2ab   : > { %s2219_s27 = smov %s2212_s2 }
 0x2ad   :  { %975 = vsyncpa [#allocation4], 1 }
 0x2ae   :  { %977 = vsyncpa [#allocation4 + $0x1], 1 }
 0x2af   :  { %978 = vsyncpa [#allocation7], 1 }
 0x2b0   :  { %980 = vsyncpa [#allocation7 + $0x1], 1 }
 0x2b1   :  { %981 = vsyncpa [#allocation5], 1 }
 0x2b2   :  { %983 = vsyncpa [#allocation5 + $0x1], 1 }

</bundles_post_ra>
